<compile_context>
chip_gen: v6e
topology: v6e:2x2x1
jax: 0.10.0
libtpu: 0.0.40
codegen_flags: <defaults>
</compile_context>

<pallas_src>
import jax
import jax.numpy as jnp
from jax import lax
from jax.experimental import pallas as pl
from jax.experimental.pallas import tpu as pltpu


def _relu6(x):
    return jnp.clip(x, 0.0, 6.0)


def _resnet2d_bn_block_kernel(x_ref, w1_ref, w2_ref, w3d_ref,
                              b1_ref, b2_ref, b3d_ref,
                              o_ref, pad_ref):
    # One batch image per grid step; everything lane-dense: (H, W*C).
    H = x_ref.shape[1]
    WCbn = w1_ref.shape[1]
    K = w2_ref.shape[0]
    P = (pad_ref.shape[0] - H) // 2          # row (kh) padding for the KxK conv

    x = x_ref[0]                                              # (H, W*Cin)

    # ---- conv1 (1x1, BN1 scale pre-folded) + bias + relu6 ----
    y1 = jnp.dot(x, w1_ref[...], preferred_element_type=jnp.float32)
    y1 = _relu6(y1 + b1_ref[...])                             # (H, W*Cbn)

    # ---- conv2 (KxK, 'same', stride 1) as K banded matmuls ----
    # kw shift + W-direction zero padding live in the weights; only the kh
    # shift needs physically padded rows.  Border rows are 2 dense vregs ->
    # rewrite them every step (cheap, and safe with "parallel" batch axis).
    pad_ref[0:P, :] = jnp.zeros((P, WCbn), jnp.float32)
    pad_ref[P + H:P + H + P, :] = jnp.zeros((P, WCbn), jnp.float32)
    pad_ref[P:P + H, :] = y1

    acc = jnp.zeros((H, WCbn), jnp.float32)
    for kh in range(K):                                       # K static, small
        acc = acc + jnp.dot(pad_ref[kh:kh + H, :], w2_ref[kh],
                            preferred_element_type=jnp.float32)
    y2 = _relu6(acc + b2_ref[...])                            # (H, W*Cbn)

    # ---- conv3 + downsample fused into ONE matmul on concat([y2, x]) ----
    cat = jnp.concatenate([y2, x], axis=-1)                   # (H, W*(Cbn+Cin))
    y3 = jnp.dot(cat, w3d_ref[...], preferred_element_type=jnp.float32)
    o_ref[0] = _relu6(y3 + b3d_ref[...])                      # (H, W*Cout)


def _build_fused_weights(w1, w2, w3, wd, s1, b1, s2, b2, s3, b3, sd, bd, W):
    """Fold BN scales into conv weights and fold the spatial W dimension into
    the matmuls so the kernel runs fully lane-dense.  Host-side, one-time."""
    Cin, Cbn = w1.shape
    K = w2.shape[0]
    Cout = w3.shape[1]
    P = (K - 1) // 2
    f32 = jnp.float32

    s1 = s1.reshape(-1).astype(f32); b1 = b1.reshape(-1).astype(f32)
    s2 = s2.reshape(-1).astype(f32); b2 = b2.reshape(-1).astype(f32)
    s3 = s3.reshape(-1).astype(f32); b3 = b3.reshape(-1).astype(f32)

    w1s = w1.astype(f32) * s1[None, :]                        # (Cin, Cbn)
    w2s = w2.astype(f32) * s2[None, None, None, :]            # (K, K, Cbn, Cbn)
    w3s = w3.astype(f32) * s3[None, :]                        # (Cbn, Cout)
    if wd is None:
        # identity residual (in_channels == channels, stride == 1)
        wds = jnp.eye(Cin, Cout, dtype=f32)
        bdf = jnp.zeros((Cout,), f32)
    else:
        sd = sd.reshape(-1).astype(f32)
        bdf = bd.reshape(-1).astype(f32)
        wds = wd.astype(f32) * sd[None, :]                    # (Cin, Cout)

    eyeW = jnp.eye(W, dtype=f32)
    # conv1: block-diagonal over the W pixels of a row.
    w1big = jnp.kron(eyeW, w1s)                               # (W*Cin, W*Cbn)
    # conv2: one banded matrix per kh; kw shift + 'same' W padding folded in.
    w2band = jnp.stack([
        sum(jnp.kron(jnp.eye(W, k=P - kw, dtype=f32), w2s[kh, kw])
            for kw in range(K))
        for kh in range(K)])                                  # (K, W*Cbn, W*Cbn)
    # conv3 + downsample stacked: applied to concat([y2, x], axis=-1).
    w3d = jnp.concatenate([jnp.kron(eyeW, w3s),
                           jnp.kron(eyeW, wds)], axis=0)      # (W*(Cbn+Cin), W*Cout)

    b1t = jnp.tile(b1, W).reshape(1, W * Cbn)
    b2t = jnp.tile(b2, W).reshape(1, W * Cbn)
    b3dt = jnp.tile(b3 + bdf, W).reshape(1, W * Cout)
    return w1big, w2band, w3d, b1t, b2t, b3dt


def resnet2d_bn_block(x_nchw, w1, w2, w3, wd, s1, b1, s2, b2, s3, b3, sd, bd):
    """x_nchw: (N, Cin, H, W) float32 -> (N, Cout, H, W) float32.
    Pass wd=sd=bd=None for the identity-residual case (Cin == Cout, stride 1)."""
    N, Cin, H, W = x_nchw.shape
    Cbn = w1.shape[1]
    Cout = w3.shape[1]
    K = w2.shape[0]
    P = (K - 1) // 2

    w1big, w2band, w3d, b1t, b2t, b3dt = _build_fused_weights(
        w1, w2, w3, wd, s1, b1, s2, b2, s3, b3, sd, bd, W)

    # NCHW -> NHWC -> lane-dense (N, H, W*Cin).  The reshape is free; the
    # transpose is one XLA relayout (skip it entirely if the caller is NHWC).
    x = jnp.transpose(x_nchw, (0, 2, 3, 1)).reshape(N, H, W * Cin)

    grid_spec = pltpu.PrefetchScalarGridSpec(
        num_scalar_prefetch=0,
        grid=(N,),
        in_specs=[
            pl.BlockSpec((1, H, W * Cin), lambda n: (n, 0, 0)),
            pl.BlockSpec((W * Cin, W * Cbn), lambda n: (0, 0)),
            pl.BlockSpec((K, W * Cbn, W * Cbn), lambda n: (0, 0, 0)),
            pl.BlockSpec((W * (Cbn + Cin), W * Cout), lambda n: (0, 0)),
            pl.BlockSpec((1, W * Cbn), lambda n: (0, 0)),     # b1 (tiled)
            pl.BlockSpec((1, W * Cbn), lambda n: (0, 0)),     # b2 (tiled)
            pl.BlockSpec((1, W * Cout), lambda n: (0, 0)),    # b3 + bd (tiled)
        ],
        out_specs=pl.BlockSpec((1, H, W * Cout), lambda n: (n, 0, 0)),
        scratch_shapes=[pltpu.VMEM((H + 2 * P, W * Cbn), jnp.float32)],
    )

    out = pl.pallas_call(
        _resnet2d_bn_block_kernel,
        out_shape=jax.ShapeDtypeStruct((N, H, W * Cout), jnp.float32),
        grid_spec=grid_spec,
        compiler_params=pltpu.CompilerParams(
            dimension_semantics=("parallel",),    # independent batch images
            vmem_limit_bytes=32 * 1024 * 1024),
    )(x, w1big, w2band, w3d, b1t, b2t, b3dt)

    out = out.reshape(N, H, W, Cout)
    return jnp.transpose(out, (0, 3, 1, 2))       # -> NCHW


def reference_forward(x_nchw, w1, w2, w3, wd, s1, b1, s2, b2, s3, b3, sd, bd):
    """Pure-JAX reference (XLA convs), for correctness checking."""
    hp = lax.Precision.HIGHEST
    x = jnp.transpose(x_nchw, (0, 2, 3, 1))
    y = jnp.einsum('nhwc,cd->nhwd', x, w1, precision=hp)
    y = jnp.clip(y * s1 + b1, 0.0, 6.0)
    K = w2.shape[0]
    pad = (K - 1) // 2
    y = lax.conv_general_dilated(
        y, w2, window_strides=(1, 1), padding=[(pad, pad), (pad, pad)],
        dimension_numbers=('NHWC', 'HWIO', 'NHWC'), precision=hp)
    y = jnp.clip(y * s2 + b2, 0.0, 6.0)
    y = jnp.einsum('nhwc,cd->nhwd', y, w3, precision=hp)
    y = y * s3 + b3
    if wd is None:
        r = x
    else:
        r = jnp.einsum('nhwc,cd->nhwd', x, wd, precision=hp) * sd + bd
    out = jnp.clip(y + r, 0.0, 6.0)
    return jnp.transpose(out, (0, 3, 1, 2))


if __name__ == "__main__":
    # Module config: in_channels=8, channels=32, expansion=4 -> bn_channels=8,
    # kernel_size=3, stride=1, norm_before=True  => downsample branch active.
    N, Cin, H, W = 2, 8, 16, 16
    channels, expansion, K = 32, 4, 3
    Cbn = channels // expansion
    eps = 1e-5

    keys = jax.random.split(jax.random.PRNGKey(0), 32)
    x = jax.random.normal(keys[0], (N, Cin, H, W), dtype=jnp.float32)

    # PyTorch Conv2d weight (Cout, Cin, kh, kw) corresponds to our
    # (Cin, Cout) / (kh, kw, Cin, Cout) layouts.
    w1 = 0.1 * jax.random.normal(keys[1], (Cin, Cbn), dtype=jnp.float32)
    w2 = 0.1 * jax.random.normal(keys[2], (K, K, Cbn, Cbn), dtype=jnp.float32)
    w3 = 0.1 * jax.random.normal(keys[3], (Cbn, channels), dtype=jnp.float32)
    wd = 0.1 * jax.random.normal(keys[4], (Cin, channels), dtype=jnp.float32)

    def bn_fold(kg, kb, km, kv, c):
        gamma = 1.0 + 0.1 * jax.random.normal(kg, (c,), dtype=jnp.float32)
        beta = 0.1 * jax.random.normal(kb, (c,), dtype=jnp.float32)
        mean = 0.1 * jax.random.normal(km, (c,), dtype=jnp.float32)
        var = jax.random.uniform(kv, (c,), dtype=jnp.float32,
                                 minval=0.5, maxval=1.5)
        scale = gamma / jnp.sqrt(var + eps)
        shift = beta - mean * scale
        return scale.reshape(1, c), shift.reshape(1, c)

    s1, b1 = bn_fold(keys[5], keys[6], keys[7], keys[8], Cbn)
    s2, b2 = bn_fold(keys[9], keys[10], keys[11], keys[12], Cbn)
    s3, b3 = bn_fold(keys[13], keys[14], keys[15], keys[16], channels)
    sd, bd = bn_fold(keys[17], keys[18], keys[19], keys[20], channels)

    # --- downsample-branch configuration (in_channels != channels) ---
    out = resnet2d_bn_block(x, w1, w2, w3, wd, s1, b1, s2, b2, s3, b3, sd, bd)
    out = jax.block_until_ready(out)
    ref = reference_forward(x, w1, w2, w3, wd, s1, b1, s2, b2, s3, b3, sd, bd)
    ref = jax.block_until_ready(ref)
    assert out.shape == (N, channels, H, W), out.shape
    err = float(jnp.max(jnp.abs(out - ref)))
    assert err < 5e-3, f"downsample config: max abs error {err}"

    # --- identity-residual configuration (in_channels == channels) ---
    Cin2 = channels
    x2 = jax.random.normal(keys[21], (N, Cin2, H, W), dtype=jnp.float32)
    w1b = 0.1 * jax.random.normal(keys[22], (Cin2, Cbn), dtype=jnp.float32)
    out2 = resnet2d_bn_block(x2, w1b, w2, w3, None,
                             s1, b1, s2, b2, s3, b3, None, None)
    out2 = jax.block_until_ready(out2)
    ref2 = reference_forward(x2, w1b, w2, w3, None,
                             s1, b1, s2, b2, s3, b3, None, None)
    ref2 = jax.block_until_ready(ref2)
    err2 = float(jnp.max(jnp.abs(out2 - ref2)))
    assert err2 < 5e-3, f"identity config: max abs error {err2}"

    print("KERNEL_OK")
</pallas_src>

<mosaic_0001>
module attributes {stable_mosaic.version = 11 : i64} {
  func.func @_resnet2d_bn_block_kernel(%arg0: i32, %arg1: memref<1x16x128xf32, #tpu.memory_space<vmem>>, %arg2: memref<128x128xf32, #tpu.memory_space<vmem>>, %arg3: memref<3x128x128xf32, #tpu.memory_space<vmem>>, %arg4: memref<256x512xf32, #tpu.memory_space<vmem>>, %arg5: memref<1x128xf32, #tpu.memory_space<vmem>>, %arg6: memref<1x128xf32, #tpu.memory_space<vmem>>, %arg7: memref<1x512xf32, #tpu.memory_space<vmem>>, %arg8: memref<1x16x512xf32, #tpu.memory_space<vmem>>, %arg9: memref<18x128xf32, #tpu.memory_space<vmem>>) attributes {dimension_semantics = [#tpu.dimension_semantics<parallel>], iteration_bounds = array<i64: 2>, scalar_prefetch = 0 : i64, scratch_operands = 1 : i64, tpu.core_type = #tpu.core_type<tc>, window_params = [{transform_indices = @transform_0, window_bounds = array<i64: 1, 16, 128>}, {pipeline_mode = #tpu.pipeline_mode<synchronous>, transform_indices = @transform_1, window_bounds = array<i64: 128, 128>}, {pipeline_mode = #tpu.pipeline_mode<synchronous>, transform_indices = @transform_2, window_bounds = array<i64: 3, 128, 128>}, {pipeline_mode = #tpu.pipeline_mode<synchronous>, transform_indices = @transform_3, window_bounds = array<i64: 256, 512>}, {pipeline_mode = #tpu.pipeline_mode<synchronous>, transform_indices = @transform_4, window_bounds = array<i64: 1, 128>}, {pipeline_mode = #tpu.pipeline_mode<synchronous>, transform_indices = @transform_5, window_bounds = array<i64: 1, 128>}, {pipeline_mode = #tpu.pipeline_mode<synchronous>, transform_indices = @transform_6, window_bounds = array<i64: 1, 512>}, {transform_indices = @transform_7, window_bounds = array<i64: 1, 16, 512>}]} {
    %c0 = arith.constant 0 : index
    %c0_0 = arith.constant 0 : index
    %c0_1 = arith.constant 0 : index
    %0 = vector.load %arg1[%c0, %c0_0, %c0_1] : memref<1x16x128xf32, #tpu.memory_space<vmem>>, vector<1x16x128xf32>
    %1 = vector.shape_cast %0 : vector<1x16x128xf32> to vector<16x128xf32>
    %c0_2 = arith.constant 0 : index
    %c0_3 = arith.constant 0 : index
    %2 = vector.load %arg2[%c0_2, %c0_3] : memref<128x128xf32, #tpu.memory_space<vmem>>, vector<128x128xf32>
    %cst = arith.constant dense<0.000000e+00> : vector<16x128xf32>
    %3 = tpu.matmul %1, %2, %cst {dimension_numbers = #tpu.dot_dimension_numbers<[1], [0], [0], [1], [0, 0, 1, 1], [], []>} : vector<16x128xf32>, vector<128x128xf32>, vector<16x128xf32> -> vector<16x128xf32>
    %c0_4 = arith.constant 0 : index
    %c0_5 = arith.constant 0 : index
    %4 = vector.load %arg5[%c0_4, %c0_5] : memref<1x128xf32, #tpu.memory_space<vmem>>, vector<1x128xf32>
    %5 = vector.broadcast %4 : vector<1x128xf32> to vector<16x128xf32>
    %6 = arith.addf %3, %5 : vector<16x128xf32>
    %cst_6 = arith.constant 0.000000e+00 : f32
    %cst_7 = arith.constant 6.000000e+00 : f32
    %7 = vector.broadcast %cst_6 : f32 to vector<16x128xf32>
    %8 = arith.maximumf %7, %6 : vector<16x128xf32>
    %9 = vector.broadcast %cst_7 : f32 to vector<16x128xf32>
    %10 = arith.minimumf %9, %8 : vector<16x128xf32>
    %cst_8 = arith.constant 0.000000e+00 : f32
    %11 = vector.broadcast %cst_8 : f32 to vector<1x128xf32>
    %c0_9 = arith.constant 0 : index
    %c0_10 = arith.constant 0 : index
    %12 = vector.load %arg9[%c0_9, %c0_10] : memref<18x128xf32, #tpu.memory_space<vmem>>, vector<1x128xf32>
    tpu.vector_store %arg9[%c0_9, %c0_10], %11 {strides = array<i32>} : memref<18x128xf32, #tpu.memory_space<vmem>>, vector<1x128xf32>,
    %cst_11 = arith.constant 0.000000e+00 : f32
    %13 = vector.broadcast %cst_11 : f32 to vector<1x128xf32>
    %c17 = arith.constant 17 : index
    %c0_12 = arith.constant 0 : index
    %14 = vector.load %arg9[%c17, %c0_12] : memref<18x128xf32, #tpu.memory_space<vmem>>, vector<1x128xf32>
    tpu.vector_store %arg9[%c17, %c0_12], %13 {strides = array<i32>} : memref<18x128xf32, #tpu.memory_space<vmem>>, vector<1x128xf32>,
    %c1 = arith.constant 1 : index
    %c0_13 = arith.constant 0 : index
    %15 = vector.load %arg9[%c1, %c0_13] : memref<18x128xf32, #tpu.memory_space<vmem>>, vector<16x128xf32>
    tpu.vector_store %arg9[%c1, %c0_13], %10 {strides = array<i32>} : memref<18x128xf32, #tpu.memory_space<vmem>>, vector<16x128xf32>,
    %cst_14 = arith.constant 0.000000e+00 : f32
    %16 = vector.broadcast %cst_14 : f32 to vector<16x128xf32>
    %c0_15 = arith.constant 0 : index
    %c0_16 = arith.constant 0 : index
    %17 = vector.load %arg9[%c0_15, %c0_16] : memref<18x128xf32, #tpu.memory_space<vmem>>, vector<16x128xf32>
    %c0_17 = arith.constant 0 : index
    %c0_18 = arith.constant 0 : index
    %c0_19 = arith.constant 0 : index
    %18 = vector.load %arg3[%c0_17, %c0_18, %c0_19] : memref<3x128x128xf32, #tpu.memory_space<vmem>>, vector<1x128x128xf32>
    %19 = vector.shape_cast %18 : vector<1x128x128xf32> to vector<128x128xf32>
    %cst_20 = arith.constant dense<0.000000e+00> : vector<16x128xf32>
    %20 = tpu.matmul %17, %19, %cst_20 {dimension_numbers = #tpu.dot_dimension_numbers<[1], [0], [0], [1], [0, 0, 1, 1], [], []>} : vector<16x128xf32>, vector<128x128xf32>, vector<16x128xf32> -> vector<16x128xf32>
    %21 = arith.addf %16, %20 : vector<16x128xf32>
    %c1_21 = arith.constant 1 : index
    %c0_22 = arith.constant 0 : index
    %22 = vector.load %arg9[%c1_21, %c0_22] : memref<18x128xf32, #tpu.memory_space<vmem>>, vector<16x128xf32>
    %c1_23 = arith.constant 1 : index
    %c0_24 = arith.constant 0 : index
    %c0_25 = arith.constant 0 : index
    %23 = vector.load %arg3[%c1_23, %c0_24, %c0_25] : memref<3x128x128xf32, #tpu.memory_space<vmem>>, vector<1x128x128xf32>
    %24 = vector.shape_cast %23 : vector<1x128x128xf32> to vector<128x128xf32>
    %cst_26 = arith.constant dense<0.000000e+00> : vector<16x128xf32>
    %25 = tpu.matmul %22, %24, %cst_26 {dimension_numbers = #tpu.dot_dimension_numbers<[1], [0], [0], [1], [0, 0, 1, 1], [], []>} : vector<16x128xf32>, vector<128x128xf32>, vector<16x128xf32> -> vector<16x128xf32>
    %26 = arith.addf %21, %25 : vector<16x128xf32>
    %c2 = arith.constant 2 : index
    %c0_27 = arith.constant 0 : index
    %27 = vector.load %arg9[%c2, %c0_27] : memref<18x128xf32, #tpu.memory_space<vmem>>, vector<16x128xf32>
    %c2_28 = arith.constant 2 : index
    %c0_29 = arith.constant 0 : index
    %c0_30 = arith.constant 0 : index
    %28 = vector.load %arg3[%c2_28, %c0_29, %c0_30] : memref<3x128x128xf32, #tpu.memory_space<vmem>>, vector<1x128x128xf32>
    %29 = vector.shape_cast %28 : vector<1x128x128xf32> to vector<128x128xf32>
    %cst_31 = arith.constant dense<0.000000e+00> : vector<16x128xf32>
    %30 = tpu.matmul %27, %29, %cst_31 {dimension_numbers = #tpu.dot_dimension_numbers<[1], [0], [0], [1], [0, 0, 1, 1], [], []>} : vector<16x128xf32>, vector<128x128xf32>, vector<16x128xf32> -> vector<16x128xf32>
    %31 = arith.addf %26, %30 : vector<16x128xf32>
    %c0_32 = arith.constant 0 : index
    %c0_33 = arith.constant 0 : index
    %32 = vector.load %arg6[%c0_32, %c0_33] : memref<1x128xf32, #tpu.memory_space<vmem>>, vector<1x128xf32>
    %33 = vector.broadcast %32 : vector<1x128xf32> to vector<16x128xf32>
    %34 = arith.addf %31, %33 : vector<16x128xf32>
    %cst_34 = arith.constant 0.000000e+00 : f32
    %cst_35 = arith.constant 6.000000e+00 : f32
    %35 = vector.broadcast %cst_34 : f32 to vector<16x128xf32>
    %36 = arith.maximumf %35, %34 : vector<16x128xf32>
    %37 = vector.broadcast %cst_35 : f32 to vector<16x128xf32>
    %38 = arith.minimumf %37, %36 : vector<16x128xf32>
    %39 = tpu.concatenate %38, %1 in 1 : vector<16x128xf32>, vector<16x128xf32> -> vector<16x256xf32>
    %c0_36 = arith.constant 0 : index
    %c0_37 = arith.constant 0 : index
    %40 = vector.load %arg4[%c0_36, %c0_37] : memref<256x512xf32, #tpu.memory_space<vmem>>, vector<256x512xf32>
    %cst_38 = arith.constant dense<0.000000e+00> : vector<16x512xf32>
    %41 = tpu.matmul %39, %40, %cst_38 {dimension_numbers = #tpu.dot_dimension_numbers<[1], [0], [0], [1], [0, 0, 1, 1], [], []>} : vector<16x256xf32>, vector<256x512xf32>, vector<16x512xf32> -> vector<16x512xf32>
    %c0_39 = arith.constant 0 : index
    %c0_40 = arith.constant 0 : index
    %42 = vector.load %arg7[%c0_39, %c0_40] : memref<1x512xf32, #tpu.memory_space<vmem>>, vector<1x512xf32>
    %43 = vector.broadcast %42 : vector<1x512xf32> to vector<16x512xf32>
    %44 = arith.addf %41, %43 : vector<16x512xf32>
    %cst_41 = arith.constant 0.000000e+00 : f32
    %cst_42 = arith.constant 6.000000e+00 : f32
    %45 = vector.broadcast %cst_41 : f32 to vector<16x512xf32>
    %46 = arith.maximumf %45, %44 : vector<16x512xf32>
    %47 = vector.broadcast %cst_42 : f32 to vector<16x512xf32>
    %48 = arith.minimumf %47, %46 : vector<16x512xf32>
    %c0_43 = arith.constant 0 : index
    %c0_44 = arith.constant 0 : index
    %c0_45 = arith.constant 0 : index
    %49 = vector.load %arg8[%c0_43, %c0_44, %c0_45] : memref<1x16x512xf32, #tpu.memory_space<vmem>>, vector<1x16x512xf32>
    %50 = vector.shape_cast %49 : vector<1x16x512xf32> to vector<16x512xf32>
    %51 = vector.shape_cast %48 : vector<16x512xf32> to vector<1x16x512xf32>
    tpu.vector_store %arg8[%c0_43, %c0_44, %c0_45], %51 {strides = array<i32>} : memref<1x16x512xf32, #tpu.memory_space<vmem>>, vector<1x16x512xf32>,
    return
  }
  func.func @transform_0(%arg0: i32) -> (i32, i32, i32) {
    %c0_i32 = arith.constant 0 : i32
    %c0_i32_0 = arith.constant 0 : i32
    %c0_i32_1 = arith.constant 0 : i32
    return %arg0, %c0_i32, %c0_i32_0 : i32, i32, i32
  }
  func.func @transform_1(%arg0: i32) -> (i32, i32) {
    %c0_i32 = arith.constant 0 : i32
    %c0_i32_0 = arith.constant 0 : i32
    %c0_i32_1 = arith.constant 0 : i32
    return %c0_i32, %c0_i32_0 : i32, i32
  }
  func.func @transform_2(%arg0: i32) -> (i32, i32, i32) {
    %c0_i32 = arith.constant 0 : i32
    %c0_i32_0 = arith.constant 0 : i32
    %c0_i32_1 = arith.constant 0 : i32
    %c0_i32_2 = arith.constant 0 : i32
    return %c0_i32, %c0_i32_0, %c0_i32_1 : i32, i32, i32
  }
  func.func @transform_3(%arg0: i32) -> (i32, i32) {
    %c0_i32 = arith.constant 0 : i32
    %c0_i32_0 = arith.constant 0 : i32
    %c0_i32_1 = arith.constant 0 : i32
    return %c0_i32, %c0_i32_0 : i32, i32
  }
  func.func @transform_4(%arg0: i32) -> (i32, i32) {
    %c0_i32 = arith.constant 0 : i32
    %c0_i32_0 = arith.constant 0 : i32
    %c0_i32_1 = arith.constant 0 : i32
    return %c0_i32, %c0_i32_0 : i32, i32
  }
  func.func @transform_5(%arg0: i32) -> (i32, i32) {
    %c0_i32 = arith.constant 0 : i32
    %c0_i32_0 = arith.constant 0 : i32
    %c0_i32_1 = arith.constant 0 : i32
    return %c0_i32, %c0_i32_0 : i32, i32
  }
  func.func @transform_6(%arg0: i32) -> (i32, i32) {
    %c0_i32 = arith.constant 0 : i32
    %c0_i32_0 = arith.constant 0 : i32
    %c0_i32_1 = arith.constant 0 : i32
    return %c0_i32, %c0_i32_0 : i32, i32
  }
  func.func @transform_7(%arg0: i32) -> (i32, i32, i32) {
    %c0_i32 = arith.constant 0 : i32
    %c0_i32_0 = arith.constant 0 : i32
    %c0_i32_1 = arith.constant 0 : i32
    return %arg0, %c0_i32, %c0_i32_0 : i32, i32, i32
  }
}

</mosaic_0001>

<bundles_post_ra>
// kernel: tpu_custom_call.1
= control target key start
LH: loop header
LB: loop body
LE: loop exit
PB: predicated region body
PF: predicated region fallthrough
CT: control target
= control target key end

     0   :  { %s1974_s0 = inlined_call_operand.hbm [shape: f32[2,16,128], index: 0, kind: input, shape index: {}]   ;;  %s1975_s1 = inlined_call_operand.hbm [shape: f32[128,128], index: 1, kind: input, shape index: {}]   ;;  %s1976_s2 = inlined_call_operand.hbm [shape: f32[3,128,128], index: 2, kind: input, shape index: {}]   ;;  %s1977_s3 = inlined_call_operand.hbm [shape: f32[256,512], index: 3, kind: input, shape index: {}]   ;;  %s1978_s4 = inlined_call_operand.vmem [shape: f32[1,128], index: 4, kind: input, shape index: {}]   ;;  %s1979_s5 = inlined_call_operand.vmem [shape: f32[1,128], index: 5, kind: input, shape index: {}]   ;;  %s1980_s6 = inlined_call_operand.vmem [shape: f32[1,512], index: 6, kind: input, shape index: {}]   ;;  %s1981_s7 = inlined_call_operand.hbm [shape: f32[2,16,512], index: 7, kind: output, shape index: {}]  }
   0x1   :  { %1988 = sst [smem:[#allocation16_spill]] %s1975_s1 }
   0x2   :  { %12 = vsyncpa [#allocation4], 0 }
   0x3   :  { %14 = vsyncpa [#allocation4 + $0x1], 0 }
   0x4   :  { %15 = vsyncpa [#allocation7], 0 }
   0x5   :  { %16 = vsyncpa [#allocation10], 0 }
   0x6   :  { %17 = vsyncpa [#allocation5], 0 }
   0x7   :  { %19 = vsyncpa [#allocation5 + $0x1], 0  ;;  %s1741_s24 = smov 0   ;;  %s1743_s25 = smov 0  }
   0x8   :  { %s1745_s26 = smov 0   ;;  %s1747_s27 = smov 0  }
   0x9 LB: > { %s1762_s28 = sadd.s32 4294967295, %s1687_s27   ;;  %s1189_s29 = sadd.s32 4294967294, %s1687_s27   ;;  %s1687_s27 = sphi %s1747_s27, %s2010_s27   ;;  %s1683_s26 = sphi %s1745_s26, %s2009_s26   ;;  %s1679_s25 = sphi %s1743_s25, %s2008_s25   ;;  %s1675_s24 = sphi %s1741_s24, %s2007_s24  }
   0xa   : > { %p45_p0 = scmp.ne.s32.totalorder %s1679_s25, %s1675_s24  ;;  %p1982_p1 = scmp.eq.s32.totalorder %s1762_s28, 0 }
   0xb   : > { %p195_p2 = scmp.eq.s32.totalorder %s1762_s28, 1  ;;  %p201_p3 = scmp.eq.s32.totalorder %s1189_s29, 1 }
   0xc   : > { %p1771_p4 = por %p1982_p1, %p45_p0  ;;  %p1190_p5 = scmp.ge.s32.totalorder %s1687_s27, 1 }
   0xd   : > { %p1776_p6 = por %p201_p3, %p45_p0  ;;  %p208_p7 = scmp.lt.s32.totalorder %s1687_s27, 3 }
   0xe   : > { %s1989_s30 = scalar_select %p1771_p4, 1, 0 }
   0xf   : > { %s1990_s8 = scalar_select %p1776_p6, 1, 0 }
  0x10   : > { %p1781_p8 = pnand %p1190_p5, %p208_p7  ;;  %s1689_s10 = smov [#allocation6]  }
  0x11   : > { %s220_s11 = sshll.u32 %s1689_s10, 4  ;;  %s1690_s13 = smov [#allocation8]   ;;  %s221_s11 = int_to_ptr.vmem [resolvable:$true] %s220_s11 }
  0x12   : > { %s1991_s9 = scalar_select %p1781_p8, 1, 0 }
  0x13   : > { %p1441_p9 = pneg %p1781_p8  ;;  %s233_s14 = sshll.u32 %s1690_s13, 4  ;;  %s234_s14 = int_to_ptr.vmem [resolvable:$true] %s233_s14 }
  0x14   : > { %s1691_s15 = smov [#allocation9]   ;;  %s1520_s17 = scalar_lea.vmem %s221_s11, 2048 }
  0x15   : > { %p1790_p11 = pnand %p1441_p9, %p1982_p1  ;;  %s246_s16 = sshll.u32 %s1691_s15, 4  ;;  %s247_s16 = int_to_ptr.vmem [resolvable:$true] %s246_s16 }
  0x16   : > { %p1521_p13 = scmp.ne.s32.totalorder %s221_s11, %s1520_s17  ;;  %p1528_p5 = scmp.lt.s32.totalorder %s221_s11, %s221_s11 }
  0x17   : > { %p1511_p12 = pneg %p1790_p11  ;;  %p1529_p7 = scmp.lt.s32.totalorder %s1520_s17, %s1520_s17 }
  0x19   : > { %p1523_p0 = pnand %p1521_p13, %p1511_p12  ;;  %p1530_p9 = por %p1529_p7, %p1528_p5 }
  0x1b   : > { %p1524_p3 = pneg %p1523_p0 }
  0x1d   : > { %p1531_p10 = pnand %p1530_p9, %p1524_p3 }
  0x1f   : > { %1534 = shalt.err (!%p1531_p10)
}
  0x20   : > { %s1983_s18 = smov 128   ;;  %s1984_s19 = smov 8  }
  0x21   : > { %s1993_s1 = sld [smem:[#allocation16_spill]]  ;;  %s1546_s22 = scalar_lea.vmem %s234_s14, 6144 }
  0x22   : > { %p1547_p13 = scmp.ne.s32.totalorder %s234_s14, %s1546_s22  ;;  %p1554_p3 = scmp.lt.s32.totalorder %s234_s14, %s234_s14 }
  0x23   : > { %p1555_p10 = scmp.lt.s32.totalorder %s1546_s22, %s1546_s22 }
  0x24   : > { %p1549_p0 = pnand %p1547_p13, %p1511_p12 }
  0x25   : > { %p1556_p7 = por %p1555_p10, %p1554_p3 }
  0x26   : > { %p1550_p5 = pneg %p1549_p0 }
  0x27   : > { %1444 = dma.hbm_to_vmem [thread:$0]  (!%p1790_p11), %s1993_s1, 2048, %s221_s11, [#allocation7], %s1983_s18, %s1983_s18, %s1984_s19  }
  0x28   : > { %p1557_p9 = pnand %p1556_p7, %p1550_p5 }
  0x2a   : > { %1560 = shalt.err (!%p1557_p9)
}
  0x2b   : > { %1447 = dma.hbm_to_vmem [thread:$0]  (!%p1790_p11), %s1976_s2, 6144, %s234_s14, [#allocation7], %s1983_s18, %s1983_s18, %s1984_s19  }
  0x2c   : > { %s1572_s10 = scalar_lea.vmem %s247_s16, 16384  ;;  %p1580_p3 = scmp.lt.s32.totalorder %s247_s16, %s247_s16 }
  0x2d   : > { %p1573_p1 = scmp.ne.s32.totalorder %s247_s16, %s1572_s10  ;;  %p1581_p5 = scmp.lt.s32.totalorder %s1572_s10, %s1572_s10 }
  0x2f   : > { %p1575_p13 = pnand %p1573_p1, %p1511_p12  ;;  %p1582_p10 = por %p1581_p5, %p1580_p3 }
  0x31   : > { %p1576_p0 = pneg %p1575_p13 }
  0x33   : > { %p1583_p7 = pnand %p1582_p10, %p1576_p0 }
  0x35   : > { %1586 = shalt.err (!%p1583_p7)
}
  0x36   : > { %s1694_s11 = smov 512   ;;  %s1695_s13 = smov 32  }
  0x37   : > { %1450 = dma.hbm_to_vmem [thread:$0]  (!%p1790_p11), %s1977_s3, 16384, %s247_s16, [#allocation10], %s1694_s11, %s1694_s11, %s1695_s13  }
  0x38   : > { %s1827_s17 = sadd.s32 1, %s1687_s27   ;;  %s32_s21 = sadd.s32 1, %s1683_s26 }
  0x39   : > { %s29_s20 = ssub.s32 %s1687_s27, %s1827_s17  ;;  %p39_p12 = scmp.ne.s32.totalorder %s1683_s26, %s1679_s25 }
  0x3a   : > { %p30_p1 = scmp.eq.s32.totalorder %s29_s20, 0  ;;  %p40_p9 = scmp.eq.s32.totalorder %s1687_s27, 0 }
  0x3b   : > { %p1462_p13 = scmp.lt.s32.totalorder %s1687_s27, 2  ;;  %p1841_p3 = por %p195_p2, %p39_p12 }
  0x3c   : > { %s1837_s22 = scalar_select %p30_p1, %s1683_s26, %s32_s21  }
  0x3d   : > { %p41_p0 = por %p40_p9, %p39_p12  ;;  %s269_s12 = sand.u32 1, %s1683_s26  }
  0x3e   : > { %s1994_s23 = scalar_select %p1841_p3, 1, 0 }
  0x3f   : > { %s1211_s29 = sshll.u32 %s1687_s27, 8  ;;  %s1195_s16 = sshll.u32 %s269_s12, 4 }
  0x40   : > { %s1850_s13 = scalar_lea.hbm %s1974_s0, %s1211_s29  ;;  %s273_s14 = scalar_lea.vmem [#allocation3], %s1195_s16 }
  0x41   : > { %s280_s15 = sshll.u32 %s273_s14, 4  ;;  %p1852_p11 = pnand %p1462_p13, %p41_p0  ;;  %s1856_s15 = int_to_ptr.vmem [resolvable:$true] %s280_s15 }
  0x42   : > { %s1858_s21 = scalar_lea.sflag [#allocation4], %s269_s12  ;;  %s1587_s18 = scalar_lea.hbm %s1850_s13, 256 }
  0x43   : > { %p1588_p2 = scmp.ne.s32.totalorder %s1850_s13, %s1587_s18  ;;  %p1589_p5 = pneg %p1852_p11 }
  0x44   : > { %s1592_s16 = scalar_lea.hbm %s1974_s0, 512  ;;  %p1593_p1 = scmp.lt.s32.totalorder %s1850_s13, %s1974_s0 }
  0x45   : > { %p1590_p10 = pnand %p1589_p5, %p1588_p2  ;;  %p1594_p12 = scmp.lt.s32.totalorder %s1592_s16, %s1587_s18 }
  0x47   : > { %p1591_p7 = pneg %p1590_p10  ;;  %p1595_p9 = por %p1594_p12, %p1593_p1 }
  0x49   : > { %p1596_p13 = pnand %p1595_p9, %p1591_p7 }
  0x4b   : > { %1599 = shalt.err (!%p1596_p13)
}
  0x4c   : > { %s1600_s12 = scalar_lea.vmem %s1856_s15, 256  ;;  %s1696_s19 = smov [#allocation3]  }
  0x4d   : > { %p1601_p0 = scmp.ne.s32.totalorder %s1856_s15, %s1600_s12  ;;  %s1605_s1 = sshll.u32 %s1696_s19, 4  ;;  %s1606_s1 = int_to_ptr.vmem [resolvable:$false] %s1605_s1 }
  0x4e   : > { %s1607_s29 = scalar_lea.vmem %s1606_s1, 512  ;;  %p1608_p10 = scmp.lt.s32.totalorder %s1856_s15, %s1606_s1 }
  0x4f   : > { %p1603_p6 = pnand %p1601_p0, %p1589_p5  ;;  %p1609_p3 = scmp.lt.s32.totalorder %s1607_s29, %s1600_s12 }
  0x51   : > { %p1604_p2 = pneg %p1603_p6  ;;  %p1610_p4 = por %p1609_p3, %p1608_p10 }
  0x53   : > { %p1611_p8 = pnand %p1610_p4, %p1604_p2 }
  0x55   : > { %1614 = shalt.err (!%p1611_p8)
}
  0x56   : > { %s1996_s18 = smov 8   ;;  %s1997_s10 = smov 128  }
  0x57   : > { %1454 = dma.hbm_to_vmem [thread:$0]  (!%p1852_p11), %s1850_s13, 256, %s1856_s15, %s1858_s21, %s1997_s10, %s1997_s10, %s1996_s18  }
  0x58   : > { %p1998_p6 = scmp.ne.s32.totalorder %s1991_s9, 0 }
  0x59   : > { %s1885_s19 = sand.u32 (!%p1998_p6), 1, %s1679_s25   ;;  %p1999_p4 = scmp.ne.s32.totalorder (!%p1998_p6), %s1989_s30, 0 }
  0x5a   : > { %292 = sbr.rel (%p1998_p6) target bundleno = 793 (0x319), region = 48  ;;  %s1199_s1 = sshll.u32 (!%p1998_p6), %s1885_s19, 4 }
  0x5b   : > { %s295_s16 = scalar_lea.sflag (!%p1998_p6), [#allocation4], %s1885_s19  ;;  %s1889_s11 = scalar_lea.vmem (!%p1998_p6), [#allocation3], %s1199_s1 }
  0x5f   : > { %1658 = dma.done.wait (%p1999_p4), %s295_s16, 256  }
  0x60   : > { %1660 = vsyncadd (%p1999_p4), %s295_s16, 4294967040  ;;  %p2000_p8 = scmp.eq.s32.totalorder %s1762_s28, 0 }
  0x62   : > { %1662 = dma.done.wait (%p2000_p8), [#allocation7], 8192   ;;  %p2001_p3 = pmov %p2000_p8 }
  0x64   : > { %1664 = vsyncadd (%p2001_p3), [#allocation7], 4294959104  ;;  %p2002_p11 = pmov %p2001_p3 }
  0x65   : > { %p2003_p5 = pmov %p2001_p3 }
  0x66   : > { %1666 = dma.done.wait (%p2002_p11), [#allocation10], 16384  }
  0x67   : > { %1668 = vsyncadd (%p2003_p5), [#allocation10], 4294950912  ;;  %v358_v0 = vld [vmem:[#allocation6 + $0x78] sm:$0xff]  ;;  %v357_v1 = vld [vmem:[#allocation6 + $0x70] sm:$0xff]  ;;  %v1697_v46 = vmov 0.0   ;;  %s1203_s14 = sshll.u32 %s1885_s19, 6 }
  0x68   : > { %1285 = vmatprep.subr.mxu0 %v358_v0  ;;  %v356_v2 = vld [vmem:[#allocation6 + $0x68] sm:$0xff]  ;;  %v355_v3 = vld [vmem:[#allocation6 + $0x60] sm:$0xff]  ;;  %v354_v5 = vld [vmem:[#allocation6 + $0x58] sm:$0xff]  ;;  %445 = vst [vmem:[#allocation2] sm:$0x1] %v1697_v46  ;;  %s340_s12 = scalar_lea.vmem [#allocation11], %s1203_s14 }
  0x69   : > { %1286 = vmatpush3.msra.mxu0 %v358_v0  ;;  %v1904_v4 = vld [vmem:[%s1889_s11] sm:$0xff]  ;;  %v485_v6 = vld [vmem:[#allocation8 + $0xf8] sm:$0xff]  ;;  %v483_v9 = vld [vmem:[#allocation8 + $0xe8] sm:$0xff]  ;;  %446 = vst [vmem:[#allocation2 + $0x11] sm:$0x1] %v1697_v46  ;;  %s1087_s29 = sshll.u32 %s340_s12, 4  ;;  %s1926_s29 = int_to_ptr.vmem [resolvable:$true] %s1087_s29 }
  0x6a   : > { %1287 = vmatprep.subr.mxu0 %v357_v1  ;;  %1317 = vmatprep.mubr.f32.mxu0 %v1904_v4  ;;  %v484_v7 = vld [vmem:[#allocation8 + $0xf0] sm:$0xff]  ;;  %v352_v10 = vld [vmem:[#allocation6 + $0x48] sm:$0xff]  ;;  %v482_v11 = vld [vmem:[#allocation8 + $0xe0] sm:$0xff]  ;;  %s1212_s18 = sshll.u32 %s1762_s28, 10  ;;  %s1074_s28 = scalar_lea.sflag [#allocation5], %s1885_s19 }
  0x6b   : > { %1288 = vmatpush3.msra.mxu0 %v357_v1  ;;  %1320 = vmatprep.subr.mxu1 %v485_v6  ;;  %v353_v8 = vld [vmem:[#allocation6 + $0x50] sm:$0xff]  ;;  %v351_v12 = vld [vmem:[#allocation6 + $0x40] sm:$0xff]  ;;  %v481_v13 = vld [vmem:[#allocation8 + $0xd8] sm:$0xff]  ;;  %s1931_s16 = scalar_lea.hbm %s1981_s7, %s1212_s18  ;;  %p2004_p1 = scmp.ne.s32.totalorder %s1994_s23, 0 }
  0x6c   : > { %1289 = vmatprep.subr.mxu0 %v356_v2  ;;  %1321 = vmatpush3.msra.mxu1 %v485_v6  ;;  %v350_v14 = vld [vmem:[#allocation6 + $0x38] sm:$0xff]  ;;  %v480_v15 = vld [vmem:[#allocation8 + $0xd0] sm:$0xff]  ;;  %v479_v17 = vld [vmem:[#allocation8 + $0xc8] sm:$0xff]  ;;  %s1698_s30 = smov [#allocation11]  }
  0x6d   : > { %1290 = vmatpush3.msra.mxu0 %v356_v2  ;;  %1322 = vmatprep.subr.mxu1 %v484_v7  ;;  %v349_v16 = vld [vmem:[#allocation6 + $0x30] sm:$0xff]  ;;  %v348_v18 = vld [vmem:[#allocation6 + $0x28] sm:$0xff]  ;;  %v478_v19 = vld [vmem:[#allocation8 + $0xc0] sm:$0xff]  ;;  %s1619_s9 = sshll.u32 %s1698_s30, 4  ;;  %s1620_s9 = int_to_ptr.vmem [resolvable:$false] %s1619_s9 }
  0x6e   : > { %1291 = vmatprep.subr.mxu0 %v355_v3  ;;  %1323 = vmatpush3.msra.mxu1 %v484_v7  ;;  %v347_v20 = vld [vmem:[#allocation6 + $0x20] sm:$0xff]  ;;  %v346_v21 = vld [vmem:[#allocation6 + $0x18] sm:$0xff]  ;;  %v345_v22 = vld [vmem:[#allocation6 + $0x10] sm:$0xff]  ;;  %s1621_s13 = scalar_lea.vmem %s1620_s9, 2048  ;;  %p1622_p13 = scmp.lt.s32.totalorder %s1926_s29, %s1620_s9 }
  0x6f   : > { %1292 = vmatpush3.msra.mxu0 %v355_v3  ;;  %1324 = vmatprep.subr.mxu1 %v483_v9  ;;  %v344_v23 = vld [vmem:[#allocation6 + $0x8] sm:$0xff]  ;;  %v343_v24 = vld [vmem:[#allocation6] sm:$0xff]  ;;  %v466_v26 = vld [vmem:[#allocation8 + $0x78] sm:$0xff] }
  0x70   : > { %1293 = vmatprep.subr.mxu0 %v354_v5  ;;  %1325 = vmatpush3.msra.mxu1 %v483_v9  ;;  %v1908_v25 = vld [vmem:[%s1889_s11 + $0x8] sm:$0xff]  ;;  %v465_v27 = vld [vmem:[#allocation8 + $0x70] sm:$0xff]  ;;  %v463_v29 = vld [vmem:[#allocation8 + $0x60] sm:$0xff]  ;;  %s1615_s11 = scalar_lea.vmem %s1926_s29, 1024 }
  0x71   : > { %1294 = vmatpush3.msra.mxu0 %v354_v5  ;;  %1326 = vmatprep.subr.mxu1 %v482_v11  ;;  %v464_v28 = vld [vmem:[#allocation8 + $0x68] sm:$0xff]  ;;  %v462_v30 = vld [vmem:[#allocation8 + $0x58] sm:$0xff]  ;;  %v461_v31 = vld [vmem:[#allocation8 + $0x50] sm:$0xff]  ;;  %p1616_p7 = scmp.ne.s32.totalorder %s1926_s29, %s1615_s11  ;;  %p1623_p0 = scmp.lt.s32.totalorder %s1621_s13, %s1615_s11 }
  0x72   : > { %1295 = vmatprep.subr.mxu0 %v353_v8  ;;  %1327 = vmatpush3.msra.mxu1 %v482_v11  ;;  %v460_v32 = vld [vmem:[#allocation8 + $0x48] sm:$0xff]  ;;  %v477_v33 = vld [vmem:[#allocation8 + $0xb8] sm:$0xff]  ;;  %v476_v34 = vld [vmem:[#allocation8 + $0xb0] sm:$0xff] }
  0x73   : > { %1296 = vmatpush3.msra.mxu0 %v353_v8  ;;  %1328 = vmatprep.subr.mxu1 %v481_v13  ;;  %v475_v35 = vld [vmem:[#allocation8 + $0xa8] sm:$0xff]  ;;  %v474_v36 = vld [vmem:[#allocation8 + $0xa0] sm:$0xff]  ;;  %v473_v38 = vld [vmem:[#allocation8 + $0x98] sm:$0xff]  ;;  %p1617_p12 = pnand %p1616_p7, %p2004_p1  ;;  %p1624_p2 = por %p1623_p0, %p1622_p13 }
  0x74   : > { %1297 = vmatprep.subr.mxu0 %v352_v10  ;;  %1329 = vmatpush3.msra.mxu1 %v481_v13  ;;  %v459_v37 = vld [vmem:[#allocation8 + $0x40] sm:$0xff]  ;;  %v458_v39 = vld [vmem:[#allocation8 + $0x38] sm:$0xff]  ;;  %v472_v40 = vld [vmem:[#allocation8 + $0x90] sm:$0xff] }
  0x75   : > { %1298 = vmatpush3.msra.mxu0 %v352_v10  ;;  %1330 = vmatprep.subr.mxu1 %v480_v15  ;;  %v457_v41 = vld [vmem:[#allocation8 + $0x30] sm:$0xff]  ;;  %v471_v42 = vld [vmem:[#allocation8 + $0x88] sm:$0xff]  ;;  %v470_v44 = vld [vmem:[#allocation8 + $0x80] sm:$0xff]  ;;  %p1618_p9 = pneg %p1617_p12 }
  0x76   : > { %1299 = vmatprep.subr.mxu0 %v351_v12  ;;  %1331 = vmatpush3.msra.mxu1 %v480_v15  ;;  %v456_v43 = vld [vmem:[#allocation8 + $0x28] sm:$0xff]  ;;  %v455_v45 = vld [vmem:[#allocation8 + $0x20] sm:$0xff]  ;;  %v654_v47 = vld [vmem:[#allocation8 + $0x178] sm:$0xff] }
  0x77   : > { %1300 = vmatpush3.msra.mxu0 %v351_v12  ;;  %1332 = vmatprep.subr.mxu1 %v479_v17  ;;  %v454_v48 = vld [vmem:[#allocation8 + $0x18] sm:$0xff]  ;;  %v453_v49 = vld [vmem:[#allocation8 + $0x10] sm:$0xff]  ;;  %v452_v50 = vld [vmem:[#allocation8 + $0x8] sm:$0xff]  ;;  %p1625_p10 = pnand %p1624_p2, %p1618_p9 }
  0x78   : > { %1301 = vmatprep.subr.mxu0 %v350_v14  ;;  %1333 = vmatpush3.msra.mxu1 %v479_v17  ;;  %v451_v51 = vld [vmem:[#allocation8] sm:$0xff]  ;;  %v806_v52 = vld [vmem:[#allocation9 + $0x1e8] sm:$0xff]  ;;  %v653_v62 = vld [vmem:[#allocation8 + $0x170] sm:$0xff] }
  0x79   : > { %1302 = vmatpush3.msra.mxu0 %v350_v14  ;;  %1334 = vmatprep.subr.mxu1 %v478_v19  ;;  %v1204_v53 = vld [vmem:[%s1978_s4] ss:$0 sm:$0xff]  ;;  %v651_v0 = vld [vmem:[#allocation8 + $0x160] sm:$0xff]  ;;  %v650_v1 = vld [vmem:[#allocation8 + $0x158] sm:$0xff] }
  0x7a   : > { %1303 = vmatprep.subr.mxu0 %v349_v16  ;;  %1335 = vmatpush3.msra.mxu1 %v478_v19  ;;  %v652_v63 = vld [vmem:[#allocation8 + $0x168] sm:$0xff]  ;;  %v805_v2 = vld [vmem:[#allocation9 + $0x1e0] sm:$0xff]  ;;  %v649_v8 = vld [vmem:[#allocation8 + $0x150] sm:$0xff] }
  0x7b   : > { %1304 = vmatpush3.msra.mxu0 %v349_v16  ;;  %1336 = vmatprep.subr.mxu1 %v477_v33  ;;  %v802_v7 = vld [vmem:[#allocation9 + $0x1c8] sm:$0xff]  ;;  %v801_v9 = vld [vmem:[#allocation9 + $0x1c0] sm:$0xff]  ;;  %v646_v17 = vld [vmem:[#allocation8 + $0x138] sm:$0xff] }
  0x7c   : > { %1305 = vmatprep.subr.mxu0 %v348_v18  ;;  %1337 = vmatpush3.msra.mxu1 %v477_v33  ;;  %v798_v10 = vld [vmem:[#allocation9 + $0x1a8] sm:$0xff]  ;;  %v797_v12 = vld [vmem:[#allocation9 + $0x1a0] sm:$0xff]  ;;  %v641_v33 = vld [vmem:[#allocation8 + $0x110] sm:$0xff] }
  0x7d   : > { %1306 = vmatpush3.msra.mxu0 %v348_v18  ;;  %1338 = vmatprep.subr.mxu1 %v476_v34  ;;  %v648_v11 = vld [vmem:[#allocation8 + $0x148] sm:$0xff]  ;;  %v647_v14 = vld [vmem:[#allocation8 + $0x140] sm:$0xff]  ;;  %v796_v46 = vld [vmem:[#allocation9 + $0x198] sm:$0xff] }
  0x7e   : > { %1307 = vmatprep.subr.mxu0 %v347_v20  ;;  %1339 = vmatpush3.msra.mxu1 %v476_v34  ;;  %v794_v13 = vld [vmem:[#allocation9 + $0x188] sm:$0xff]  ;;  %v793_v15 = vld [vmem:[#allocation9 + $0x180] sm:$0xff] }
  0x7f   : > { %1308 = vmatpush3.msra.mxu0 %v347_v20  ;;  %1340 = vmatprep.subr.mxu1 %v475_v35  ;;  %v790_v16 = vld [vmem:[#allocation9 + $0x168] sm:$0xff]  ;;  %v789_v18 = vld [vmem:[#allocation9 + $0x160] sm:$0xff]  ;;  %v645_v20 = vld [vmem:[#allocation8 + $0x130] sm:$0xff] }
  0x80   : > { %1309 = vmatprep.subr.mxu0 %v346_v21  ;;  %1341 = vmatpush3.msra.mxu1 %v475_v35  ;;  %v786_v19 = vld [vmem:[#allocation9 + $0x148] sm:$0xff]  ;;  %v769_v34 = vld [vmem:[#allocation9 + $0xc0] sm:$0xff] }
  0x81   : > { %1310 = vmatpush3.msra.mxu0 %v346_v21  ;;  %1342 = vmatprep.subr.mxu1 %v474_v36  ;;  %v785_v21 = vld [vmem:[#allocation9 + $0x140] sm:$0xff]  ;;  %v766_v35 = vld [vmem:[#allocation9 + $0xa8] sm:$0xff] }
  0x82   : > { %1311 = vmatprep.subr.mxu0 %v345_v22  ;;  %1343 = vmatpush3.msra.mxu1 %v474_v36  ;;  %v640_v36 = vld [vmem:[#allocation8 + $0x108] sm:$0xff] }
  0x83   : > { %1312 = vmatpush3.msra.mxu0 %v345_v22  ;;  %1344 = vmatprep.subr.mxu1 %v473_v38  ;;  %v782_v22 = vld [vmem:[#allocation9 + $0x128] sm:$0xff] }
  0x84   : > { %1313 = vmatprep.subr.mxu0 %v344_v23  ;;  %1345 = vmatpush3.msra.mxu1 %v473_v38  ;;  %v639_v38 = vld [vmem:[#allocation8 + $0x100] sm:$0xff] }
  0x85   : > { %1314 = vmatpush3.msra.mxu0 %v344_v23  ;;  %1346 = vmatprep.subr.mxu1 %v472_v40  ;;  %v644_v23 = vld [vmem:[#allocation8 + $0x128] sm:$0xff] }
  0x86   : > { %1315 = vmatprep.subr.mxu0 %v343_v24  ;;  %1347 = vmatpush3.msra.mxu1 %v472_v40  ;;  %v807_v40 = vld [vmem:[#allocation9 + $0x1f0] sm:$0xff] }
  0x87   : > { %1316 = vmatpush3.msra.mxu0 %v343_v24  ;;  %1348 = vmatprep.subr.mxu1 %v471_v42  ;;  %v781_v24 = vld [vmem:[#allocation9 + $0x120] sm:$0xff] }
  0x88   : > { %1318 = vmatmul.mubr.f32.vlgmr.msra.gmra.mxu0 %v1908_v25  ;;  %1355 = vmatprep.subr.mxu0 %v466_v26 }
  0x89   : > { %1356 = vmatpush3.msra.mxu0 %v466_v26  ;;  %1349 = vmatpush3.msra.mxu1 %v471_v42  ;;  %v778_v26 = vld [vmem:[#allocation9 + $0x108] sm:$0xff]  ;;  %v804_v42 = vld [vmem:[#allocation9 + $0x1d8] sm:$0xff] }
  0x8a   : > { %1357 = vmatprep.subr.mxu0 %v465_v27  ;;  %1350 = vmatprep.subr.mxu1 %v470_v44 }
  0x8b   : > { %1358 = vmatpush3.msra.mxu0 %v465_v27  ;;  %1351 = vmatpush3.msra.mxu1 %v470_v44  ;;  %v643_v27 = vld [vmem:[#allocation8 + $0x120] sm:$0xff]  ;;  %v800_v44 = vld [vmem:[#allocation9 + $0x1b8] sm:$0xff] }
  0x8c   : > { %1359 = vmatprep.subr.mxu0 %v464_v28  ;;  %1390 = vmatprep.subr.mxu1 %v654_v47 }
  0x8d   : > { %1360 = vmatpush3.msra.mxu0 %v464_v28  ;;  %v777_v28 = vld [vmem:[#allocation9 + $0x100] sm:$0xff] }
  0x8e   : > { %1361 = vmatprep.subr.mxu0 %v463_v29 }
  0x8f   : > { %1362 = vmatpush3.msra.mxu0 %v463_v29  ;;  %v774_v29 = vld [vmem:[#allocation9 + $0xe8] sm:$0xff] }
  0x90   : > { %1363 = vmatprep.subr.mxu0 %v462_v30 }
  0x91   : > { %1364 = vmatpush3.msra.mxu0 %v462_v30  ;;  %v642_v30 = vld [vmem:[#allocation8 + $0x118] sm:$0xff] }
  0x92   : > { %1365 = vmatprep.subr.mxu0 %v461_v31 }
  0x93   : > { %1366 = vmatpush3.msra.mxu0 %v461_v31  ;;  %v773_v31 = vld [vmem:[#allocation9 + $0xe0] sm:$0xff] }
  0x94   : > { %1367 = vmatprep.subr.mxu0 %v460_v32 }
  0x95   : > { %1368 = vmatpush3.msra.mxu0 %v460_v32  ;;  %v770_v32 = vld [vmem:[#allocation9 + $0xc8] sm:$0xff] }
  0x96   : > { %1369 = vmatprep.subr.mxu0 %v459_v37 }
  0x97   : > { %1370 = vmatpush3.msra.mxu0 %v459_v37  ;;  %v765_v37 = vld [vmem:[#allocation9 + $0xa0] sm:$0xff] }
  0x98   : > { %1371 = vmatprep.subr.mxu0 %v458_v39 }
  0x99   : > { %1372 = vmatpush3.msra.mxu0 %v458_v39  ;;  %v808_v39 = vld [vmem:[#allocation9 + $0x1f8] sm:$0xff] }
  0x9a   : > { %1373 = vmatprep.subr.mxu0 %v457_v41 }
  0x9b   : > { %1374 = vmatpush3.msra.mxu0 %v457_v41 }
  0x9c   : > { %1375 = vmatprep.subr.mxu0 %v456_v43 }
  0x9d   : > { %1376 = vmatpush3.msra.mxu0 %v456_v43  ;;  %v803_v43 = vld [vmem:[#allocation9 + $0x1d0] sm:$0xff] }
  0x9e   : > { %1377 = vmatprep.subr.mxu0 %v455_v45 }
  0x9f   : > { %1378 = vmatpush3.msra.mxu0 %v455_v45  ;;  %v799_v45 = vld [vmem:[#allocation9 + $0x1b0] sm:$0xff] }
  0xa0   : > { %1379 = vmatprep.subr.mxu0 %v454_v48 }
  0xa1   : > { %1380 = vmatpush3.msra.mxu0 %v454_v48  ;;  %v792_v48 = vld [vmem:[#allocation9 + $0x178] sm:$0xff] }
  0xa2   : > { %1381 = vmatprep.subr.mxu0 %v453_v49 }
  0xa3   : > { %1382 = vmatpush3.msra.mxu0 %v453_v49  ;;  %v791_v49 = vld [vmem:[#allocation9 + $0x170] sm:$0xff] }
  0xa4   : > { %1383 = vmatprep.subr.mxu0 %v452_v50 }
  0xa5   : > { %1384 = vmatpush3.msra.mxu0 %v452_v50  ;;  %v788_v50 = vld [vmem:[#allocation9 + $0x158] sm:$0xff] }
  0xa6   : > { %1385 = vmatprep.subr.mxu0 %v451_v51 }
  0xa7   : > { %1386 = vmatpush3.msra.mxu0 %v451_v51  ;;  %v787_v51 = vld [vmem:[#allocation9 + $0x150] sm:$0xff] }
  0xa8   : > { %895 = vmatprep.subr.mxu0 %v806_v52  ;;  %v784_v52 = vld [vmem:[#allocation9 + $0x138] sm:$0xff] }
 0x148   : > { %v1319_v54 = vpop.f32.mrf.mxu0 }
 0x149   : > { %v438_v55 = vadd.f32 %v1319_v54, %v1204_v53  ;;  %v779_v54 = vld [vmem:[#allocation9 + $0x110] sm:$0xff] }
 0x14a   : > { %v432_v56 = vpop.f32.mrf.mxu0 }
 0x14b   : > { %v442_v57 = vmax.f32 %v438_v55, 0.0  ;;  %v433_v58 = vadd.f32 %v1204_v53, %v432_v56  ;;  %v783_v53 = vld [vmem:[#allocation9 + $0x130] sm:$0xff]  ;;  %v776_v55 = vld [vmem:[#allocation9 + $0xf8] sm:$0xff] }
 0x14c   : > { %v775_v56 = vld [vmem:[#allocation9 + $0xf0] sm:$0xff] }
 0x14d   : > { %v444_v59 = vmin.f32 %v442_v57, 6.0  ;;  %v441_v60 = vmax.f32 %v433_v58, 0.0  ;;  %v772_v57 = vld [vmem:[#allocation9 + $0xd8] sm:$0xff]  ;;  %v771_v58 = vld [vmem:[#allocation9 + $0xd0] sm:$0xff] }
 0x14f   : > { %448 = vst [vmem:[#allocation2 + $0x9] sm:$0xff] %v444_v59  ;;  %v443_v61 = vmin.f32 %v441_v60, 6.0  ;;  %v767_v60 = vld [vmem:[#allocation9 + $0xb0] sm:$0xff] }
 0x151   : > { %447 = vst [vmem:[#allocation2 + $0x1] sm:$0xff] %v443_v61  ;;  %1352 = vmatprep.mubr.f32.mxu1 %v443_v61  ;;  %v762_v61 = vld [vmem:[#allocation9 + $0x88] sm:$0xff] }
 0x152   : > { %1353 = vmatmul.mubr.f32.vlgmr.msra.gmra.mxu1 %v444_v59  ;;  %v768_v59 = vld [vmem:[#allocation9 + $0xb8] sm:$0xff] }
 0x153   : > { %1391 = vmatpush3.msra.mxu1 %v654_v47  ;;  %v795_v47 = vld [vmem:[#allocation9 + $0x190] sm:$0xff] }
 0x154   : > { %1392 = vmatprep.subr.mxu1 %v653_v62 }
 0x155   : > { %1393 = vmatpush3.msra.mxu1 %v653_v62  ;;  %v764_v62 = vld [vmem:[#allocation9 + $0x98] sm:$0xff] }
 0x156   : > { %1394 = vmatprep.subr.mxu1 %v652_v63  ;;  %v637_v41 = vld [vmem:[#allocation2 + $0xa] sm:$0xff] }
 0x157   : > { %1395 = vmatpush3.msra.mxu1 %v652_v63  ;;  %v761_v63 = vld [vmem:[#allocation9 + $0x80] sm:$0xff] }
 0x158   : > { %v449_v3 = vld [vmem:[#allocation2] sm:$0xff]  ;;  %v450_v5 = vld [vmem:[#allocation2 + $0x8] sm:$0xff]  ;;  %1396 = vmatprep.subr.mxu1 %v651_v0 }
 0x159   : > { %v636_v6 = vld [vmem:[#allocation2 + $0x2] sm:$0xff]  ;;  %1387 = vmatprep.mubr.f32.mxu0 %v449_v3  ;;  %1397 = vmatpush3.msra.mxu1 %v651_v0  ;;  %v757_v3 = vld [vmem:[#allocation9 + $0x60] sm:$0xff] }
 0x15a   : > { %1422 = vmatprep.mubr.f32.mxu1 %v636_v6  ;;  %1388 = vmatmul.mubr.f32.vlgmr.msra.gmra.mxu0 %v450_v5  ;;  %v763_v0 = vld [vmem:[#allocation9 + $0x90] sm:$0xff]  ;;  %v754_v6 = vld [vmem:[#allocation9 + $0x48] sm:$0xff] }
 0x15b   : > { %1398 = vmatprep.subr.mxu1 %v650_v1  ;;  %896 = vmatpush1.msra.mxu0 %v805_v2  ;;  %v760_v2 = vld [vmem:[#allocation9 + $0x78] sm:$0xff]  ;;  %v759_v5 = vld [vmem:[#allocation9 + $0x70] sm:$0xff] }
 0x15c   : > { %1399 = vmatpush3.msra.mxu1 %v650_v1  ;;  %897 = vmatprep.subr.mxu0 %v802_v7  ;;  %v758_v1 = vld [vmem:[#allocation9 + $0x68] sm:$0xff]  ;;  %v756_v7 = vld [vmem:[#allocation9 + $0x58] sm:$0xff] }
 0x15d   : > { %1400 = vmatprep.subr.mxu1 %v649_v8  ;;  %898 = vmatpush1.msra.mxu0 %v801_v9  ;;  %v755_v9 = vld [vmem:[#allocation9 + $0x50] sm:$0xff] }
 0x15e   : > { %1401 = vmatpush3.msra.mxu1 %v649_v8  ;;  %899 = vmatprep.subr.mxu0 %v798_v10  ;;  %v753_v8 = vld [vmem:[#allocation9 + $0x40] sm:$0xff]  ;;  %v750_v10 = vld [vmem:[#allocation9 + $0x28] sm:$0xff] }
 0x15f   : > { %1402 = vmatprep.subr.mxu1 %v648_v11  ;;  %900 = vmatpush1.msra.mxu0 %v797_v12  ;;  %v749_v12 = vld [vmem:[#allocation9 + $0x20] sm:$0xff] }
 0x160   : > { %1403 = vmatpush3.msra.mxu1 %v648_v11  ;;  %901 = vmatprep.subr.mxu0 %v794_v13  ;;  %v752_v11 = vld [vmem:[#allocation9 + $0x38] sm:$0xff]  ;;  %v751_v13 = vld [vmem:[#allocation9 + $0x30] sm:$0xff] }
 0x161   : > { %1404 = vmatprep.subr.mxu1 %v647_v14  ;;  %902 = vmatpush1.msra.mxu0 %v793_v15  ;;  %v748_v15 = vld [vmem:[#allocation9 + $0x18] sm:$0xff] }
 0x162   : > { %1405 = vmatpush3.msra.mxu1 %v647_v14  ;;  %903 = vmatprep.subr.mxu0 %v790_v16  ;;  %v746_v14 = vld [vmem:[#allocation9 + $0x8] sm:$0xff]  ;;  %v745_v16 = vld [vmem:[#allocation9] sm:$0xff] }
 0x163   : > { %1406 = vmatprep.subr.mxu1 %v646_v17  ;;  %904 = vmatpush1.msra.mxu0 %v789_v18  ;;  %v870_v18 = vld [vmem:[#allocation9 + $0x3e8] sm:$0xff] }
 0x164   : > { %1407 = vmatpush3.msra.mxu1 %v646_v17  ;;  %905 = vmatprep.subr.mxu0 %v786_v19  ;;  %v747_v17 = vld [vmem:[#allocation9 + $0x10] sm:$0xff]  ;;  %v872_v19 = vld [vmem:[#allocation9 + $0x3f8] sm:$0xff] }
 0x165   : > { %1408 = vmatprep.subr.mxu1 %v645_v20  ;;  %906 = vmatpush1.msra.mxu0 %v785_v21  ;;  %v871_v21 = vld [vmem:[#allocation9 + $0x3f0] sm:$0xff] }
 0x166   : > { %1409 = vmatpush3.msra.mxu1 %v645_v20  ;;  %907 = vmatprep.subr.mxu0 %v782_v22  ;;  %v869_v20 = vld [vmem:[#allocation9 + $0x3e0] sm:$0xff]  ;;  %v866_v22 = vld [vmem:[#allocation9 + $0x3c8] sm:$0xff] }
 0x167   : > { %1410 = vmatprep.subr.mxu1 %v644_v23  ;;  %908 = vmatpush1.msra.mxu0 %v781_v24  ;;  %v865_v24 = vld [vmem:[#allocation9 + $0x3c0] sm:$0xff] }
 0x168   : > { %1411 = vmatpush3.msra.mxu1 %v644_v23  ;;  %909 = vmatprep.subr.mxu0 %v778_v26  ;;  %v868_v23 = vld [vmem:[#allocation9 + $0x3d8] sm:$0xff]  ;;  %v867_v26 = vld [vmem:[#allocation9 + $0x3d0] sm:$0xff] }
 0x169   : > { %1412 = vmatprep.subr.mxu1 %v643_v27  ;;  %910 = vmatpush1.msra.mxu0 %v777_v28  ;;  %v864_v28 = vld [vmem:[#allocation9 + $0x3b8] sm:$0xff] }
 0x16a   : > { %1413 = vmatpush3.msra.mxu1 %v643_v27  ;;  %911 = vmatprep.subr.mxu0 %v774_v29  ;;  %v862_v27 = vld [vmem:[#allocation9 + $0x3a8] sm:$0xff]  ;;  %v861_v29 = vld [vmem:[#allocation9 + $0x3a0] sm:$0xff] }
 0x16b   : > { %1414 = vmatprep.subr.mxu1 %v642_v30  ;;  %912 = vmatpush1.msra.mxu0 %v773_v31  ;;  %v858_v31 = vld [vmem:[#allocation9 + $0x388] sm:$0xff] }
 0x16c   : > { %1415 = vmatpush3.msra.mxu1 %v642_v30  ;;  %913 = vmatprep.subr.mxu0 %v770_v32  ;;  %v863_v30 = vld [vmem:[#allocation9 + $0x3b0] sm:$0xff]  ;;  %v860_v32 = vld [vmem:[#allocation9 + $0x398] sm:$0xff] }
 0x16d   : > { %1416 = vmatprep.subr.mxu1 %v641_v33  ;;  %914 = vmatpush1.msra.mxu0 %v769_v34  ;;  %v859_v34 = vld [vmem:[#allocation9 + $0x390] sm:$0xff] }
 0x16e   : > { %1417 = vmatpush3.msra.mxu1 %v641_v33  ;;  %915 = vmatprep.subr.mxu0 %v766_v35  ;;  %v857_v33 = vld [vmem:[#allocation9 + $0x380] sm:$0xff]  ;;  %v854_v35 = vld [vmem:[#allocation9 + $0x368] sm:$0xff] }
 0x16f   : > { %1418 = vmatprep.subr.mxu1 %v640_v36  ;;  %916 = vmatpush1.msra.mxu0 %v765_v37  ;;  %v853_v37 = vld [vmem:[#allocation9 + $0x360] sm:$0xff] }
 0x170   : > { %1419 = vmatpush3.msra.mxu1 %v640_v36  ;;  %959 = vmatprep.mubr.f32.mxu0 %v1904_v4  ;;  %v856_v36 = vld [vmem:[#allocation9 + $0x378] sm:$0xff] }
 0x171   : > { %1420 = vmatprep.subr.mxu1 %v639_v38  ;;  %917 = vmatprep.subr.mxu0 %v762_v61  ;;  %v831_v61 = vld [vmem:[#allocation9 + $0x2b0] sm:$0xff] }
 0x172   : > { %1421 = vmatpush3.msra.mxu1 %v639_v38  ;;  %918 = vmatpush1.msra.mxu0 %v761_v63  ;;  %v855_v38 = vld [vmem:[#allocation9 + $0x370] sm:$0xff]  ;;  %v828_v63 = vld [vmem:[#allocation9 + $0x298] sm:$0xff] }
 0x173   : > { %1423 = vmatmul.mubr.f32.vlgmr.msra.gmra.mxu1 %v637_v41  ;;  %972 = vmatprep.subr.mxu1 %v808_v39  ;;  %v850_v39 = vld [vmem:[#allocation9 + $0x348] sm:$0xff]  ;;  %v849_v41 = vld [vmem:[#allocation9 + $0x340] sm:$0xff] }
 0x174   : > { %973 = vmatpush1.msra.mxu1 %v807_v40  ;;  %1036 = vmatprep.mubr.f32.mxu1 %v1904_v4  ;;  %v780_v4 = vld [vmem:[#allocation9 + $0x118] sm:$0xff] }
 0x175   : > { %974 = vmatprep.subr.mxu1 %v804_v42  ;;  %919 = vmatprep.subr.mxu0 %v758_v1  ;;  %v852_v40 = vld [vmem:[#allocation9 + $0x358] sm:$0xff]  ;;  %v851_v42 = vld [vmem:[#allocation9 + $0x350] sm:$0xff] }
 0x176   : > { %975 = vmatpush1.msra.mxu1 %v803_v43  ;;  %920 = vmatpush1.msra.mxu0 %v757_v3  ;;  %v846_v43 = vld [vmem:[#allocation9 + $0x328] sm:$0xff]  ;;  %v827_v1 = vld [vmem:[#allocation9 + $0x290] sm:$0xff]  ;;  %v824_v3 = vld [vmem:[#allocation9 + $0x278] sm:$0xff] }
 0x177   : > { %976 = vmatprep.subr.mxu1 %v800_v44  ;;  %921 = vmatprep.subr.mxu0 %v754_v6  ;;  %v848_v44 = vld [vmem:[#allocation9 + $0x338] sm:$0xff]  ;;  %v823_v6 = vld [vmem:[#allocation9 + $0x270] sm:$0xff] }
 0x178   : > { %977 = vmatpush1.msra.mxu1 %v799_v45  ;;  %922 = vmatpush1.msra.mxu0 %v753_v8  ;;  %v845_v45 = vld [vmem:[#allocation9 + $0x320] sm:$0xff]  ;;  %v820_v8 = vld [vmem:[#allocation9 + $0x258] sm:$0xff] }
 0x179   : > { %978 = vmatprep.subr.mxu1 %v796_v46  ;;  %923 = vmatprep.subr.mxu0 %v750_v10  ;;  %v847_v46 = vld [vmem:[#allocation9 + $0x330] sm:$0xff] }
 0x17a   : > { %979 = vmatpush1.msra.mxu1 %v795_v47  ;;  %924 = vmatpush1.msra.mxu0 %v749_v12  ;;  %v842_v47 = vld [vmem:[#allocation9 + $0x308] sm:$0xff]  ;;  %v819_v10 = vld [vmem:[#allocation9 + $0x250] sm:$0xff]  ;;  %v816_v12 = vld [vmem:[#allocation9 + $0x238] sm:$0xff] }
 0x17b   : > { %980 = vmatprep.subr.mxu1 %v792_v48  ;;  %925 = vmatprep.subr.mxu0 %v746_v14  ;;  %v844_v48 = vld [vmem:[#allocation9 + $0x318] sm:$0xff]  ;;  %v815_v14 = vld [vmem:[#allocation9 + $0x230] sm:$0xff] }
 0x17c   : > { %981 = vmatpush1.msra.mxu1 %v791_v49  ;;  %926 = vmatpush1.msra.mxu0 %v745_v16  ;;  %v841_v49 = vld [vmem:[#allocation9 + $0x300] sm:$0xff]  ;;  %v812_v16 = vld [vmem:[#allocation9 + $0x218] sm:$0xff] }
 0x17d   : > { %982 = vmatprep.subr.mxu1 %v788_v50  ;;  %927 = vmatprep.subr.mxu0 %v870_v18  ;;  %v843_v50 = vld [vmem:[#allocation9 + $0x310] sm:$0xff] }
 0x17e   : > { %983 = vmatpush1.msra.mxu1 %v787_v51  ;;  %928 = vmatpush2.msra.mxu0 %v869_v20  ;;  %v838_v51 = vld [vmem:[#allocation9 + $0x2e8] sm:$0xff]  ;;  %v811_v18 = vld [vmem:[#allocation9 + $0x210] sm:$0xff] }
 0x17f   : > { %984 = vmatprep.subr.mxu1 %v784_v52  ;;  %929 = vmatprep.subr.mxu0 %v866_v22  ;;  %v840_v52 = vld [vmem:[#allocation9 + $0x2f8] sm:$0xff] }
 0x180   : > { %985 = vmatpush1.msra.mxu1 %v783_v53  ;;  %930 = vmatpush2.msra.mxu0 %v865_v24  ;;  %v837_v53 = vld [vmem:[#allocation9 + $0x2e0] sm:$0xff] }
 0x181   : > { %986 = vmatprep.subr.mxu1 %v780_v4  ;;  %931 = vmatprep.subr.mxu0 %v862_v27  ;;  %v839_v4 = vld [vmem:[#allocation9 + $0x2f0] sm:$0xff] }
 0x182   : > { %987 = vmatpush1.msra.mxu1 %v779_v54  ;;  %932 = vmatpush2.msra.mxu0 %v861_v29  ;;  %v834_v54 = vld [vmem:[#allocation9 + $0x2c8] sm:$0xff] }
 0x183   : > { %988 = vmatprep.subr.mxu1 %v776_v55  ;;  %933 = vmatprep.subr.mxu0 %v858_v31  ;;  %v836_v55 = vld [vmem:[#allocation9 + $0x2d8] sm:$0xff] }
 0x184   : > { %989 = vmatpush1.msra.mxu1 %v775_v56  ;;  %934 = vmatpush2.msra.mxu0 %v857_v33  ;;  %v833_v56 = vld [vmem:[#allocation9 + $0x2c0] sm:$0xff] }
 0x185   : > { %990 = vmatprep.subr.mxu1 %v772_v57  ;;  %935 = vmatprep.subr.mxu0 %v854_v35  ;;  %v835_v57 = vld [vmem:[#allocation9 + $0x2d0] sm:$0xff] }
 0x186   : > { %991 = vmatpush1.msra.mxu1 %v771_v58  ;;  %936 = vmatpush2.msra.mxu0 %v853_v37  ;;  %v830_v58 = vld [vmem:[#allocation9 + $0x2a8] sm:$0xff]  ;;  %v875_v37 = vlaneseq }
 0x187   : > { %992 = vmatprep.subr.mxu1 %v768_v59  ;;  %937 = vmatprep.subr.mxu0 %v850_v39  ;;  %v832_v59 = vld [vmem:[#allocation9 + $0x2b8] sm:$0xff] }
 0x188   : > { %993 = vmatpush1.msra.mxu1 %v767_v60  ;;  %938 = vmatpush2.msra.mxu0 %v849_v41  ;;  %v829_v60 = vld [vmem:[#allocation9 + $0x2a0] sm:$0xff]  ;;  %v873_v41 = vld [vmem:[%s1980_s6] sm:$0xf] }
 0x189   : > { %994 = vmatprep.subr.mxu1 %v764_v62  ;;  %939 = vmatprep.subr.mxu0 %v846_v43  ;;  %v826_v62 = vld [vmem:[#allocation9 + $0x288] sm:$0xff] }
 0x18a   : > { %995 = vmatpush1.msra.mxu1 %v763_v0  ;;  %940 = vmatpush2.msra.mxu0 %v845_v45  ;;  %v825_v0 = vld [vmem:[#allocation9 + $0x280] sm:$0xff] }
 0x18b   : > { %996 = vmatprep.subr.mxu1 %v760_v2  ;;  %941 = vmatprep.subr.mxu0 %v842_v47  ;;  %v822_v2 = vld [vmem:[#allocation9 + $0x268] sm:$0xff] }
 0x18c   : > { %997 = vmatpush1.msra.mxu1 %v759_v5  ;;  %942 = vmatpush2.msra.mxu0 %v841_v49  ;;  %v821_v5 = vld [vmem:[#allocation9 + $0x260] sm:$0xff] }
 0x18d   : > { %998 = vmatprep.subr.mxu1 %v756_v7  ;;  %943 = vmatprep.subr.mxu0 %v838_v51  ;;  %v818_v7 = vld [vmem:[#allocation9 + $0x248] sm:$0xff] }
 0x18e   : > { %999 = vmatpush1.msra.mxu1 %v755_v9  ;;  %944 = vmatpush2.msra.mxu0 %v837_v53  ;;  %v817_v9 = vld [vmem:[#allocation9 + $0x240] sm:$0xff] }
 0x18f   : > { %1000 = vmatprep.subr.mxu1 %v752_v11  ;;  %945 = vmatprep.subr.mxu0 %v834_v54  ;;  %v814_v11 = vld [vmem:[#allocation9 + $0x228] sm:$0xff] }
 0x190   : > { %1001 = vmatpush1.msra.mxu1 %v751_v13  ;;  %946 = vmatpush2.msra.mxu0 %v833_v56  ;;  %v813_v13 = vld [vmem:[#allocation9 + $0x220] sm:$0xff] }
 0x191   : > { %1002 = vmatprep.subr.mxu1 %v748_v15  ;;  %947 = vmatprep.subr.mxu0 %v830_v58  ;;  %v810_v15 = vld [vmem:[#allocation9 + $0x208] sm:$0xff] }
 0x192   : > { %1003 = vmatpush1.msra.mxu1 %v747_v17  ;;  %948 = vmatpush2.msra.mxu0 %v829_v60  ;;  %v809_v17 = vld [vmem:[#allocation9 + $0x200] sm:$0xff] }
 0x193   : > { %1004 = vmatprep.subr.mxu1 %v872_v19  ;;  %949 = vmatprep.subr.mxu0 %v826_v62 }
 0x194   : > { %1005 = vmatpush2.msra.mxu1 %v871_v21  ;;  %950 = vmatpush2.msra.mxu0 %v825_v0 }
 0x195   : > { %1006 = vmatprep.subr.mxu1 %v868_v23  ;;  %951 = vmatprep.subr.mxu0 %v822_v2 }
 0x196   : > { %1007 = vmatpush2.msra.mxu1 %v867_v26  ;;  %952 = vmatpush2.msra.mxu0 %v821_v5 }
 0x197   : > { %1008 = vmatprep.subr.mxu1 %v864_v28  ;;  %953 = vmatprep.subr.mxu0 %v818_v7  ;;  %v1205_v28 = vld [vmem:[%s1979_s5] ss:$0 sm:$0xff] }
 0x198   : > { %1009 = vmatpush2.msra.mxu1 %v863_v30  ;;  %954 = vmatpush2.msra.mxu0 %v817_v9 }
 0x199   : > { %1010 = vmatprep.subr.mxu1 %v860_v32  ;;  %955 = vmatprep.subr.mxu0 %v814_v11 }
 0x19a   : > { %1011 = vmatpush2.msra.mxu1 %v859_v34  ;;  %956 = vmatpush2.msra.mxu0 %v813_v13 }
 0x19b   : > { %1012 = vmatprep.subr.mxu1 %v856_v36  ;;  %957 = vmatprep.subr.mxu0 %v810_v15 }
 0x19c   : > { %1013 = vmatpush2.msra.mxu1 %v855_v38  ;;  %958 = vmatpush2.msra.mxu0 %v809_v17  ;;  %v876_v38 = vshrl.u32 %v875_v37, 7 }
 0x19d   : > { %1014 = vmatprep.subr.mxu1 %v852_v40 }
 0x19e   : > { %1015 = vmatpush2.msra.mxu1 %v851_v42  ;;  %v877_v39 = vsub.s32 0, %v876_v38  ;;  %v885_v40 = vsub.s32 2, %v876_v38  ;;  %v881_v42 = vsub.s32 1, %v876_v38  ;;  %v889_v43 = vsub.s32 3, %v876_v38 }
 0x19f   : > { %1016 = vmatprep.subr.mxu1 %v848_v44 }
 0x1a0   : > { %1017 = vmatpush2.msra.mxu1 %v847_v46  ;;  %v878_v44 = vrot.slane %v873_v41, %v877_v39  ;;  %v886_v45 = vrot.slane %v873_v41, %v885_v40  ;;  %v882_v46 = vrot.slane %v873_v41, %v881_v42  ;;  %v890_v47 = vrot.slane %v873_v41, %v889_v43 }
 0x1a1   : > { %1018 = vmatprep.subr.mxu1 %v844_v48 }
 0x1a2   : > { %1019 = vmatpush2.msra.mxu1 %v843_v50 }
 0x1a3   : > { %1020 = vmatprep.subr.mxu1 %v840_v52 }
 0x1a4   : > { %1021 = vmatpush2.msra.mxu1 %v839_v4 }
 0x1a5   : > { %1022 = vmatprep.subr.mxu1 %v836_v55 }
 0x1a6   : > { %1023 = vmatpush2.msra.mxu1 %v835_v57 }
 0x1a7   : > { %1024 = vmatprep.subr.mxu1 %v832_v59 }
 0x1a8   : > { %1025 = vmatpush2.msra.mxu1 %v831_v61 }
 0x1a9   : > { %1026 = vmatprep.subr.mxu1 %v828_v63 }
 0x1aa   : > { %1027 = vmatpush2.msra.mxu1 %v827_v1 }
 0x1ab   : > { %1028 = vmatprep.subr.mxu1 %v824_v3 }
 0x1ac   : > { %1029 = vmatpush2.msra.mxu1 %v823_v6 }
 0x1ad   : > { %1030 = vmatprep.subr.mxu1 %v820_v8 }
 0x1ae   : > { %1031 = vmatpush2.msra.mxu1 %v819_v10 }
 0x1af   : > { %1032 = vmatprep.subr.mxu1 %v816_v12 }
 0x1b0   : > { %1033 = vmatpush2.msra.mxu1 %v815_v14 }
 0x1b1   : > { %1034 = vmatprep.subr.mxu1 %v812_v16 }
 0x1b2   : > { %1035 = vmatpush2.msra.mxu1 %v811_v18 }
 0x212   : > { %v1354_v19 = vpop.f32.mrf.mxu1 }
 0x214   : > { %v552_v21 = vpop.f32.mrf.mxu1 }
 0x21a   : > { %v1389_v20 = vpop.f32.mrf.mxu0 }
 0x21b   : > { %v633_v23 = vadd.f32 %v1389_v20, %v1354_v19 }
 0x21c   : > { %v627_v22 = vpop.f32.mrf.mxu0 }
 0x21d   : > { %v628_v26 = vadd.f32 %v627_v22, %v552_v21 }
 0x233   : > { %v1424_v24 = vpop.f32.mrf.mxu1 }
 0x234   : > { %v731_v27 = vadd.f32 %v1424_v24, %v633_v23 }
 0x235   : > { %v721_v29 = vpop.f32.mrf.mxu1 }
 0x236   : > { %v730_v30 = vadd.f32 %v721_v29, %v628_v26  ;;  %v740_v31 = vadd.f32 %v1205_v28, %v731_v27 }
 0x238   : > { %v739_v32 = vadd.f32 %v1205_v28, %v730_v30  ;;  %v742_v34 = vmax.f32 %v740_v31, 0.0 }
 0x23a   : > { %v741_v33 = vmax.f32 %v739_v32, 0.0  ;;  %v744_v36 = vmin.f32 %v742_v34, 6.0 }
 0x23c   : > { %v743_v35 = vmin.f32 %v741_v33, 6.0 }
 0x23e   : > { %960 = vmatmul.mubr.f32.vlgmr.msra.gmra.mxu0 %v743_v35  ;;  %1037 = vmatmul.mubr.f32.vlgmr.msra.gmra.mxu1 %v743_v35 }
 0x23f   : > { %965 = vmatprep.mubr.f32.mxu0 %v1908_v25  ;;  %1042 = vmatprep.mubr.f32.mxu1 %v1908_v25 }
 0x242   : > { %966 = vmatmul.mubr.f32.gmra.mxu0 %v744_v36  ;;  %1043 = vmatmul.mubr.f32.gmra.mxu1 %v744_v36 }
 0x2fe   : > { %v961_v48 = vpop.f32.mrf.mxu0  ;;  %v1038_v25 = vpop.f32.mrf.mxu1 }
 0x2ff   : > { %v962_v49 = vadd.f32 %v961_v48, %v878_v44  ;;  %v1039_v50 = vadd.f32 %v1038_v25, %v886_v45 }
 0x300   : > { %v963_v51 = vpop.f32.mrf.mxu0  ;;  %v1040_v52 = vpop.f32.mrf.mxu1 }
 0x301   : > { %v1049_v53 = vmax.f32 %v962_v49, 0.0  ;;  %v1051_v4 = vmax.f32 %v1039_v50, 0.0  ;;  %v964_v54 = vadd.f32 %v963_v51, %v882_v46  ;;  %v1041_v55 = vadd.f32 %v1040_v52, %v890_v47 }
 0x302   : > { %v967_v56 = vpop.f32.mrf.mxu0  ;;  %v1044_v57 = vpop.f32.mrf.mxu1 }
 0x303   : > { %v1057_v58 = vmin.f32 %v1049_v53, 6.0  ;;  %v1059_v59 = vmin.f32 %v1051_v4, 6.0  ;;  %v1050_v60 = vmax.f32 %v964_v54, 0.0  ;;  %v1052_v61 = vmax.f32 %v1041_v55, 0.0 }
 0x304   : > { %v968_v62 = vadd.f32 %v967_v56, %v878_v44  ;;  %v1045_v63 = vadd.f32 %v1044_v57, %v886_v45  ;;  %v969_v0 = vpop.f32.mrf.mxu0  ;;  %v1046_v1 = vpop.f32.mrf.mxu1 }
 0x305   : > { %1065 = vst [vmem:[%s340_s12] sm:$0xff] %v1057_v58  ;;  %1067 = vst [vmem:[%s340_s12 + $0x10] sm:$0xff] %v1059_v59  ;;  %v1058_v2 = vmin.f32 %v1050_v60, 6.0  ;;  %v1060_v3 = vmin.f32 %v1052_v61, 6.0  ;;  %v970_v5 = vadd.f32 %v969_v0, %v882_v46  ;;  %v1047_v6 = vadd.f32 %v1046_v1, %v890_v47 }
 0x306   : > { %v1053_v7 = vmax.f32 %v968_v62, 0.0  ;;  %v1055_v8 = vmax.f32 %v1045_v63, 0.0 }
 0x307   : > { %1066 = vst [vmem:[%s340_s12 + $0x8] sm:$0xff] %v1058_v2  ;;  %1068 = vst [vmem:[%s340_s12 + $0x18] sm:$0xff] %v1060_v3  ;;  %v1054_v9 = vmax.f32 %v970_v5, 0.0  ;;  %v1056_v10 = vmax.f32 %v1047_v6, 0.0 }
 0x308   : > { %v1061_v11 = vmin.f32 %v1053_v7, 6.0  ;;  %v1063_v12 = vmin.f32 %v1055_v8, 6.0 }
 0x309   : > { %v1062_v13 = vmin.f32 %v1054_v9, 6.0  ;;  %v1064_v14 = vmin.f32 %v1056_v10, 6.0 }
 0x30a   : > { %1069 = vst [vmem:[%s340_s12 + $0x20] sm:$0xff] %v1061_v11  ;;  %1071 = vst [vmem:[%s340_s12 + $0x30] sm:$0xff] %v1063_v12 }
 0x30b   : > { %1070 = vst [vmem:[%s340_s12 + $0x28] sm:$0xff] %v1062_v13  ;;  %1072 = vst [vmem:[%s340_s12 + $0x38] sm:$0xff] %v1064_v14 }
 0x30c   : > { %1628 = shalt.err (!%p1625_p10)
}
 0x30d   : > { %s1629_s15 = scalar_lea.hbm %s1931_s16, 1024  ;;  %s1633_s14 = scalar_lea.hbm %s1981_s7, 2048 }
 0x30e   : > { %p1630_p6 = scmp.ne.s32.totalorder %s1931_s16, %s1629_s15  ;;  %p1634_p3 = scmp.lt.s32.totalorder %s1931_s16, %s1981_s7 }
 0x30f   : > { %p1635_p11 = scmp.lt.s32.totalorder %s1633_s14, %s1629_s15 }
 0x310   : > { %p1631_p4 = pnand %p1630_p6, %p2004_p1 }
 0x311   : > { %p1636_p5 = por %p1635_p11, %p1634_p3 }
 0x312   : > { %p1632_p8 = pneg %p1631_p4 }
 0x314   : > { %p1637_p7 = pnand %p1636_p5, %p1632_p8 }
 0x316   : > { %1640 = shalt.err (!%p1637_p7)
}
 0x317   : > { %s1699_s10 = smov 512   ;;  %s1700_s1 = smov 32  }
 0x318   : > { %1439 = dma.vmem_to_hbm [thread:$0]  (%p2004_p1), %s1926_s29, 1024, %s1931_s16, %s1074_s28, %s1699_s10, %s1699_s10, %s1700_s1  }
 0x319 PF: > { %s1102_s11 = sand.u32 1, %s1675_s24   ;;  %p2005_p12 = scmp.ne.s32.totalorder %s1990_s8, 0 }
 0x31a   : > { %p2006_p9 = scmp.ge.s32.totalorder %s1687_s27, 2  ;;  %s1103_s30 = scalar_lea.sflag [#allocation5], %s1102_s11 }
 0x31c   : > { %p1456_p13 = pnand %p2006_p9, %p2005_p12 }
 0x31e   : > { %p1457_p0 = pneg %p1456_p13 }
 0x320   : > { %1670 = dma.done.wait (%p1457_p0), %s1103_s30, 1024  }
 0x321   : > { %1672 = vsyncadd (%p1457_p0), %s1103_s30, 4294966272  ;;  %p22_p2 = scmp.ge.s32.totalorder %s1827_s17, 4   ;;  %s2007_s24 = smov %s1679_s25 }
 0x322   : > { %s2008_s25 = smov %s1683_s26  ;;  %s2009_s26 = smov %s1837_s22 }
 0x323   : > { %s2010_s27 = smov %s1827_s17  ;;  %24 = sbr.rel (!%p22_p2) target bundleno = 9 (0x9), region = 107 }
 0x328   :  { %1108 = vsyncpa [#allocation4], 1 }
 0x329   :  { %1110 = vsyncpa [#allocation4 + $0x1], 1 }
 0x32a   :  { %1111 = vsyncpa [#allocation7], 1 }
 0x32b   :  { %1112 = vsyncpa [#allocation10], 1 }
 0x32c   :  { %1113 = vsyncpa [#allocation5], 1 }
 0x32d   :  { %1115 = vsyncpa [#allocation5 + $0x1], 1 }

</bundles_post_ra>
